<compile_context>
chip_gen: v5e
topology: v5e:2x2
jax: 0.10.0
libtpu: 0.0.40
codegen_flags: <defaults>
</compile_context>

<pallas_src>
import functools

import jax
import jax.numpy as jnp
from jax import lax
from jax.experimental import pallas as pl
from jax.experimental.pallas import tpu as pltpu

N_INPUT = 129
N_CLASSES = 129


def _round_up(x, m):
    return (x + m - 1) // m * m


def _vmem_ceiling():
    """Device VMEM capacity minus headroom (safe on v5e/v6e/v7x)."""
    try:
        cap = int(pltpu.get_tpu_info().vmem_capacity_bytes)
    except Exception:
        cap = 64 << 20
    return max(cap - (16 << 20), 32 << 20)


# ---------------------------------------------------------------------------
# Fully-parallel matmul + bias (hoisted input projection), bf16 MXU operands.
# ---------------------------------------------------------------------------
def _matmul_bias_kernel(x_ref, w_ref, b_ref, o_ref):
    acc = jnp.dot(x_ref[...].astype(w_ref.dtype), w_ref[...],
                  preferred_element_type=jnp.float32) + b_ref[...]
    o_ref[...] = acc.astype(o_ref.dtype)


def _matmul_bias(x, w, b, out_dtype, *, tm_max=1024):
    """(M, K) f32 @ (K, N) bf16 + (1, N) f32 -> (M, N) out_dtype."""
    M, K = x.shape
    N = w.shape[1]
    tm = min(_round_up(M, 8), tm_max)
    m_pad = _round_up(M, tm)
    if m_pad != M:
        x = jnp.pad(x, ((0, m_pad - M), (0, 0)))

    k_lanes = _round_up(K, 128)
    n_lanes = _round_up(N, 128)
    need = (2 * tm * k_lanes * x.dtype.itemsize          # x blocks (dbl-buffered)
            + 2 * _round_up(K, 8) * n_lanes * 2          # weight (bf16)
            + 2 * 8 * n_lanes * 4                        # bias
            + 2 * tm * n_lanes * jnp.dtype(out_dtype).itemsize)
    vmem_limit = int(min(max(2 * need, 8 << 20), _vmem_ceiling()))

    out = pl.pallas_call(
        _matmul_bias_kernel,
        out_shape=jax.ShapeDtypeStruct((m_pad, N), out_dtype),
        grid_spec=pltpu.PrefetchScalarGridSpec(
            num_scalar_prefetch=0,
            grid=(m_pad // tm,),
            in_specs=[
                pl.BlockSpec((tm, K), lambda i: (i, 0)),
                pl.BlockSpec((K, N), lambda i: (0, 0)),
                pl.BlockSpec((1, N), lambda i: (0, 0)),
            ],
            out_specs=pl.BlockSpec((tm, N), lambda i: (i, 0)),
        ),
        compiler_params=pltpu.CompilerParams(
            dimension_semantics=("parallel",),
            vmem_limit_bytes=vmem_limit,
        ),
    )(x, w, b)
    return out[:M]


# ---------------------------------------------------------------------------
# Sequential LSTM recurrence, time-blocked, with fused output projection.
# ---------------------------------------------------------------------------
def _lstm_recurrence_kernel(pregates_ref, whh_ref, wlin_ref, blin_ref,
                            out_ref, h_sc, c_sc, *, tt, hidden, unroll):
    """One grid step = TT timesteps of the recurrence + fused output proj.

    pregates_ref: (TT, B, G_pad) bf16   x @ W_ih^T + b for these timesteps
    whh_ref     : (H, G_pad)     bf16   hidden->gates weights (VMEM-resident)
    wlin_ref    : (H, n_cls)     bf16   output projection weights (resident)
    blin_ref    : (1, n_cls)     f32    output projection bias
    out_ref     : (TT, B, n_cls) f32    logits for this time block
    h_sc, c_sc  : (B, H)         f32    recurrent state (persists across grid)
    """
    @pl.when(pl.program_id(0) == 0)
    def _():
        h_sc[...] = jnp.zeros_like(h_sc)
        c_sc[...] = jnp.zeros_like(c_sc)

    def sigmoid(x):                      # one EUP op per gate (vs exp + recip)
        return 0.5 * jnp.tanh(0.5 * x) + 0.5

    def step(t, carry):
        h = h_sc[...]
        c = c_sc[...]
        # gates = pregate_t + h @ W_hh^T   (PyTorch gate order i, f, g, o)
        # TODO(synk): verify in the bundle dump that Mosaic keeps W_hh resident
        #             in the MXU across the unrolled steps (else drive it with
        #             pltpu.matmul_push_rhs / matmul_acc_lhs / matmul_pop).
        gates = pregates_ref[t].astype(jnp.float32) + jnp.dot(
            h.astype(jnp.bfloat16), whh_ref[...],
            preferred_element_type=jnp.float32)
        i_g = sigmoid(gates[:, 0 * hidden:1 * hidden])
        f_g = sigmoid(gates[:, 1 * hidden:2 * hidden])
        g_g = jnp.tanh(gates[:, 2 * hidden:3 * hidden])
        o_g = sigmoid(gates[:, 3 * hidden:4 * hidden])
        c_new = f_g * c + i_g * g_g
        h_new = o_g * jnp.tanh(c_new)
        h_sc[...] = h_new
        c_sc[...] = c_new
        # Fused output projection: off the recurrent critical path, MXU idle.
        logits = jnp.dot(h_new.astype(jnp.bfloat16), wlin_ref[...],
                         preferred_element_type=jnp.float32) + blin_ref[...]
        out_ref[t] = logits.astype(out_ref.dtype)
        return carry

    lax.fori_loop(0, tt, step, None, unroll=unroll)


def model_forward(inputs, params, hidden_size, *, tt=128):
    """inputs: (B, T, N_INPUT) float32 -> (B, T, n_classes) float32."""
    B, T, n_in = inputs.shape
    H = hidden_size
    n_cls = params["w_lin"].shape[0]
    G = 4 * H
    G_pad = _round_up(G, 128)                    # pad only the total gate width
    B_sub = _round_up(B, 8)
    H_sub = _round_up(H, 8)
    c_lanes = _round_up(n_cls, 128)
    vmem_ceiling = _vmem_ceiling()

    # ---- weights: bf16 MXU operands, f32 biases ---------------------------
    wih = jnp.pad(params["w_ih"].T, ((0, 0), (0, G_pad - G))).astype(jnp.bfloat16)
    whh = jnp.pad(params["w_hh"].T, ((0, 0), (0, G_pad - G))).astype(jnp.bfloat16)
    b_gate = jnp.pad(params["b_ih"] + params["b_hh"],
                     (0, G_pad - G)).reshape(1, G_pad).astype(jnp.float32)
    wlin = params["w_lin"].T.astype(jnp.bfloat16)                 # (H, n_cls)
    blin = params["b_lin"].reshape(1, n_cls).astype(jnp.float32)

    # ---- time block TT derived from the VMEM budget -----------------------
    per_t_bytes = B_sub * (2 * G_pad * 2 + 2 * c_lanes * 4)   # dbl-buffered blocks
    blk_budget = min(vmem_ceiling // 4, 16 << 20)
    TT = int(min(tt, max(8, (blk_budget // per_t_bytes) // 8 * 8),
                 _round_up(T, 8)))
    T_pad = _round_up(T, TT)
    unroll = min(TT, 8)

    x_p = inputs if T_pad == T else jnp.pad(
        inputs, ((0, 0), (0, T_pad - T), (0, 0)))

    # ---- 1) hoisted input projection over ALL timesteps -> bf16 pre-gates --
    x_tm = jnp.transpose(x_p, (1, 0, 2)).reshape(T_pad * B, n_in)
    pregates = _matmul_bias(x_tm, wih, b_gate, jnp.bfloat16)
    pregates = pregates.reshape(T_pad, B, G_pad)

    # ---- 2) sequential recurrence with fused output projection -------------
    rec_need = (2 * TT * B_sub * G_pad * 2          # pre-gate blocks (bf16, dbl)
                + 2 * TT * B_sub * c_lanes * 4      # logits blocks (f32, dbl)
                + 2 * H_sub * G_pad * 2             # W_hh (bf16)
                + 2 * H_sub * c_lanes * 2           # W_lin (bf16)
                + 2 * 8 * c_lanes * 4               # b_lin
                + 2 * B_sub * _round_up(H, 128) * 4)  # h / c scratch
    rec_vmem = int(min(max(2 * rec_need, 16 << 20), vmem_ceiling))

    logits_tm = pl.pallas_call(
        functools.partial(_lstm_recurrence_kernel, tt=TT, hidden=H,
                          unroll=unroll),
        out_shape=jax.ShapeDtypeStruct((T_pad, B, n_cls), jnp.float32),
        grid_spec=pltpu.PrefetchScalarGridSpec(
            num_scalar_prefetch=0,
            grid=(T_pad // TT,),
            in_specs=[
                pl.BlockSpec((TT, B, G_pad), lambda i: (i, 0, 0)),
                pl.BlockSpec((H, G_pad), lambda i: (0, 0)),
                pl.BlockSpec((H, n_cls), lambda i: (0, 0)),
                pl.BlockSpec((1, n_cls), lambda i: (0, 0)),
            ],
            out_specs=pl.BlockSpec((TT, B, n_cls), lambda i: (i, 0, 0)),
            scratch_shapes=[
                pltpu.VMEM((B, H), jnp.float32),   # h state (f32, kept across grid)
                pltpu.VMEM((B, H), jnp.float32),   # c state
            ],
        ),
        compiler_params=pltpu.CompilerParams(
            dimension_semantics=("arbitrary",),    # recurrent carry: sequential
            vmem_limit_bytes=rec_vmem,
        ),
    )(pregates, whh, wlin, blin)

    # Final (T, B, C) -> (B, T, C) relayout left to XLA (single pass).
    return jnp.transpose(logits_tm[:T], (1, 0, 2))


# ---------------------------------------------------------------------------
# Pure-JAX reference (mirrors the PyTorch forward) and deterministic init.
# ---------------------------------------------------------------------------
def _reference_forward(inputs, params, hidden_size):
    B, T, _ = inputs.shape
    H = hidden_size
    wih_t = params["w_ih"].T
    whh_t = params["w_hh"].T
    b = params["b_ih"] + params["b_hh"]
    wlin_t = params["w_lin"].T
    blin = params["b_lin"]

    def step(carry, x_t):
        h, c = carry
        gates = x_t @ wih_t + h @ whh_t + b
        i_g = jax.nn.sigmoid(gates[:, 0 * H:1 * H])
        f_g = jax.nn.sigmoid(gates[:, 1 * H:2 * H])
        g_g = jnp.tanh(gates[:, 2 * H:3 * H])
        o_g = jax.nn.sigmoid(gates[:, 3 * H:4 * H])
        c = f_g * c + i_g * g_g
        h = o_g * jnp.tanh(c)
        return (h, c), h @ wlin_t + blin

    h0 = jnp.zeros((B, H), jnp.float32)
    c0 = jnp.zeros((B, H), jnp.float32)
    _, outs = jax.lax.scan(step, (h0, c0), jnp.transpose(inputs, (1, 0, 2)))
    return jnp.transpose(outs, (1, 0, 2))


def init_params(key, hidden_size):
    """Deterministic init matching the PyTorch module's parameter shapes."""
    H = hidden_size
    k = 1.0 / jnp.sqrt(jnp.float32(H))
    keys = jax.random.split(key, 6)
    w_ih = jax.random.uniform(keys[0], (4 * H, N_INPUT), jnp.float32, -k, k)
    w_hh = jax.random.uniform(keys[1], (4 * H, H), jnp.float32, -k, k)
    b_ih = jax.random.uniform(keys[2], (4 * H,), jnp.float32, -k, k)
    b_hh = jax.random.uniform(keys[3], (4 * H,), jnp.float32, -k, k)
    # fg_init = -4.0: forget-gate bias slice set to -4.0 (split over b_ih/b_hh)
    b_ih = b_ih.at[H:2 * H].set(-4.0)
    b_hh = b_hh.at[H:2 * H].set(0.0)
    w_lin = jax.random.uniform(keys[4], (N_CLASSES, H), jnp.float32, -k, k)
    b_lin = jax.random.uniform(keys[5], (N_CLASSES,), jnp.float32, -k, k)
    return {"w_ih": w_ih, "w_hh": w_hh, "b_ih": b_ih, "b_hh": b_hh,
            "w_lin": w_lin, "b_lin": b_lin}


if __name__ == "__main__":
    hidden_size = 32
    batch = 2
    seq_len = 8

    key = jax.random.PRNGKey(0)
    k_x, k_p = jax.random.split(key)
    inputs = jax.random.normal(k_x, (batch, seq_len, N_INPUT), jnp.float32)
    params = init_params(k_p, hidden_size)

    out = jax.block_until_ready(model_forward(inputs, params, hidden_size))
    ref = jax.block_until_ready(_reference_forward(inputs, params, hidden_size))

    assert out.shape == (batch, seq_len, N_CLASSES)
    # bf16 MXU operands + bf16-streamed pre-gates -> tolerance loosened vs the
    # all-f32 reference (typical |err| ~ a few 1e-3 at these shapes).
    assert jnp.allclose(out, ref, atol=2e-2, rtol=2e-2), \
        float(jnp.max(jnp.abs(out - ref)))

    print("KERNEL_OK")
</pallas_src>

<mosaic_0001>
module attributes {stable_mosaic.version = 11 : i64} {
  func.func @_matmul_bias_kernel(%arg0: i32, %arg1: memref<16x129xf32, #tpu.memory_space<vmem>>, %arg2: memref<129x128xbf16, #tpu.memory_space<vmem>>, %arg3: memref<1x128xf32, #tpu.memory_space<vmem>>, %arg4: memref<16x128xbf16, #tpu.memory_space<vmem>>) attributes {dimension_semantics = [#tpu.dimension_semantics<parallel>], iteration_bounds = array<i64: 1>, scalar_prefetch = 0 : i64, scratch_operands = 0 : i64, tpu.core_type = #tpu.core_type<tc>, window_params = [{transform_indices = @transform_0, window_bounds = array<i64: 16, 129>}, {pipeline_mode = #tpu.pipeline_mode<synchronous>, transform_indices = @transform_1, window_bounds = array<i64: 129, 128>}, {pipeline_mode = #tpu.pipeline_mode<synchronous>, transform_indices = @transform_2, window_bounds = array<i64: 1, 128>}, {transform_indices = @transform_3, window_bounds = array<i64: 16, 128>}]} {
    %c0 = arith.constant 0 : index
    %c0_0 = arith.constant 0 : index
    %0 = vector.load %arg1[%c0, %c0_0] : memref<16x129xf32, #tpu.memory_space<vmem>>, vector<16x129xf32>
    %1 = arith.truncf %0 : vector<16x129xf32> to vector<16x129xbf16>
    %c0_1 = arith.constant 0 : index
    %c0_2 = arith.constant 0 : index
    %2 = vector.load %arg2[%c0_1, %c0_2] : memref<129x128xbf16, #tpu.memory_space<vmem>>, vector<129x128xbf16>
    %cst = arith.constant dense<0.000000e+00> : vector<16x128xf32>
    %3 = tpu.matmul %1, %2, %cst {dimension_numbers = #tpu.dot_dimension_numbers<[1], [0], [0], [1], [0, 0, 1, 1], [], []>} : vector<16x129xbf16>, vector<129x128xbf16>, vector<16x128xf32> -> vector<16x128xf32>
    %c0_3 = arith.constant 0 : index
    %c0_4 = arith.constant 0 : index
    %4 = vector.load %arg3[%c0_3, %c0_4] : memref<1x128xf32, #tpu.memory_space<vmem>>, vector<1x128xf32>
    %5 = vector.broadcast %4 : vector<1x128xf32> to vector<16x128xf32>
    %6 = arith.addf %3, %5 : vector<16x128xf32>
    %7 = arith.truncf %6 : vector<16x128xf32> to vector<16x128xbf16>
    %c0_5 = arith.constant 0 : index
    %c0_6 = arith.constant 0 : index
    %8 = vector.load %arg4[%c0_5, %c0_6] : memref<16x128xbf16, #tpu.memory_space<vmem>>, vector<16x128xbf16>
    tpu.vector_store %arg4[%c0_5, %c0_6], %7 {strides = array<i32>} : memref<16x128xbf16, #tpu.memory_space<vmem>>, vector<16x128xbf16>,
    return
  }
  func.func @transform_0(%arg0: i32) -> (i32, i32) {
    %c0_i32 = arith.constant 0 : i32
    %c0_i32_0 = arith.constant 0 : i32
    return %arg0, %c0_i32 : i32, i32
  }
  func.func @transform_1(%arg0: i32) -> (i32, i32) {
    %c0_i32 = arith.constant 0 : i32
    %c0_i32_0 = arith.constant 0 : i32
    %c0_i32_1 = arith.constant 0 : i32
    return %c0_i32, %c0_i32_0 : i32, i32
  }
  func.func @transform_2(%arg0: i32) -> (i32, i32) {
    %c0_i32 = arith.constant 0 : i32
    %c0_i32_0 = arith.constant 0 : i32
    %c0_i32_1 = arith.constant 0 : i32
    return %c0_i32, %c0_i32_0 : i32, i32
  }
  func.func @transform_3(%arg0: i32) -> (i32, i32) {
    %c0_i32 = arith.constant 0 : i32
    %c0_i32_0 = arith.constant 0 : i32
    return %arg0, %c0_i32 : i32, i32
  }
}

</mosaic_0001>

<bundles_post_ra>
// kernel: tpu_custom_call.1
= control target key start
LH: loop header
LB: loop body
LE: loop exit
PB: predicated region body
PF: predicated region fallthrough
CT: control target
= control target key end

     0   :  { %8 = vsyncpa [#allocation3], 0  ;;  %s367_s0 = inlined_call_operand.hbm [shape: f32[16,129], index: 0, kind: input, shape index: {}]   ;;  %s368_s1 = inlined_call_operand.hbm [shape: bf16[129,128], index: 1, kind: input, shape index: {}]   ;;  %s369_s2 = inlined_call_operand.vmem [shape: f32[1,128], index: 2, kind: input, shape index: {}]   ;;  %s370_s3 = inlined_call_operand.hbm [shape: bf16[16,128], index: 3, kind: output, shape index: {}]  }
   0x1   :  { %9 = vsyncpa [#allocation6], 0 }
   0x2   :  { %10 = vsyncpa [#allocation4], 0  ;;  %s15_s14 = sshll.u32 %s367_s0, 4  ;;  %s321_s15 = smov [#allocation2]   ;;  %s16_s14 = int_to_ptr.hbm [resolvable:$true] %s15_s14 }
   0x3   :  { %s17_s16 = sshll.u32 %s321_s15, 4  ;;  %s28_s19 = sshll.u32 %s368_s1, 4  ;;  %s18_s16 = int_to_ptr.vmem [resolvable:$true] %s17_s16  ;;  %s29_s19 = int_to_ptr.hbm [resolvable:$true] %s28_s19 }
   0x4   :  { %s322_s20 = smov 256   ;;  %s323_s21 = smov 16  }
   0x5   :  { %23 = dma.hbm_to_vmem [thread:$0]  %s16_s14, 512, %s18_s16, [#allocation3], %s322_s20, %s322_s20, %s323_s21  }
   0x6   :  { %s324_s22 = smov [#allocation5]   ;;  %s325_s24 = smov 64  }
   0x7   :  { %s30_s23 = sshll.u32 %s324_s22, 4  ;;  %s326_s25 = smov 4   ;;  %s31_s23 = int_to_ptr.vmem [resolvable:$true] %s30_s23 }
   0x8   :  { %36 = dma.hbm_to_vmem [thread:$0]  %s29_s19, 1088, %s31_s23, [#allocation6], %s325_s24, %s325_s24, %s326_s25  }
   0x9   :  { %315 = dma.done.wait [#allocation3], 512  }
   0xa   :  { %316 = vsyncadd [#allocation3], 4294966784 }
   0xb   :  { %317 = dma.done.wait [#allocation6], 1088  }
   0xc   :  { %318 = vsyncadd [#allocation6], 4294966208  ;;  %v228_v0 = vld [vmem:[#allocation5 + $0x38] sm:$0xff]  ;;  %vm130_vm0 = vcmask 1040384   ;;  %v227_v1 = vld [vmem:[#allocation5 + $0x30] sm:$0xff]  ;;  %v327_v4 = vmov 0  }
   0xd   :  { %136 = vmatpush.bf16.msra.mxu0 %v228_v0  ;;  %v70_v2 = vld [vmem:[#allocation5 + $0x40] sm:$0x1]  ;;  %v132_v5 = vsel %vm130_vm0, 65535, %v327_v4  ;;  %v49_v7 = vld [vmem:[#allocation2 + $0x8] sm:$0xff]  ;;  %v51_v8 = vld [vmem:[#allocation2 + $0x18] sm:$0xff]  ;;  %vm126_vm1 = vcmask 7168  }
   0xe   :  { %v108_v3 = vunpack.c.l.b16 %v70_v2  ;;  %v226_v9 = vld [vmem:[#allocation5 + $0x28] sm:$0xff]  ;;  %v53_v11 = vpack.c.bf16 %v51_v8, %v49_v7  ;;  %v225_v12 = vld [vmem:[#allocation5 + $0x20] sm:$0xff]  ;;  %v224_v13 = vld [vmem:[#allocation5 + $0x18] sm:$0xff]  ;;  %s328_s26 = smov [#allocation7]   ;;  %s174_s30 = sshll.u32 %s370_s3, 4  ;;  %s175_s30 = int_to_ptr.hbm [resolvable:$true] %s174_s30 }
   0xf   :  { %v223_v14 = vld [vmem:[#allocation5 + $0x10] sm:$0xff]  ;;  %v222_v15 = vld [vmem:[#allocation5 + $0x8] sm:$0xff]  ;;  %v221_v16 = vld [vmem:[#allocation5] sm:$0xff]  ;;  %s172_s27 = sshll.u32 %s328_s26, 4  ;;  %s173_s27 = int_to_ptr.vmem [resolvable:$true] %s172_s27 }
  0x10   :  { %v117_v6 = vpack.c.b16 %v108_v3, %v108_v3  ;;  %v48_v17 = vld [vmem:[#allocation2] sm:$0xff]  ;;  %v50_v18 = vld [vmem:[#allocation2 + $0x10] sm:$0xff] }
  0x11   :  { %137 = vmatpush.bf16.msra.mxu0 %v227_v1  ;;  %v52_v19 = vpack.c.bf16 %v50_v18, %v48_v17  ;;  %v242_v22 = vld [vmem:[%s369_s2] ss:$0 sm:$0xff] }
  0x12   :  { %v134_v10 = vand.u32 %v132_v5, %v117_v6 }
  0x14   :  { %157 = vmatpush.bf16.msra.mxu1 %v134_v10 }
  0x15   :  { %138 = vmatpush.bf16.msra.mxu0 %v226_v9 }
  0x17   :  { %220 = vmatmul.msk.bf16.vlgmr.msra.gmra.mxu1 %vm126_vm1, %v53_v11 }
  0x19   :  { %139 = vmatpush.bf16.msra.mxu0 %v225_v12 }
  0x1d   :  { %140 = vmatpush.bf16.msra.mxu0 %v224_v13 }
  0x21   :  { %141 = vmatpush.bf16.msra.mxu0 %v223_v14 }
  0x25   :  { %142 = vmatpush.bf16.msra.mxu0 %v222_v15 }
  0x29   :  { %143 = vmatpush.bf16.msra.mxu0 %v221_v16 }
  0x2c   :  { %144 = vmatmul.bf16.vlgmr.msra.gmra.mxu0 %v52_v19 }
  0x94   :  { %v159_v20 = vpop.f32.mrf.mxu1 }
  0x9c   :  { %v161_v26 = vpop.f32.mrf.mxu1 }
  0xa9   :  { %v145_v21 = vpop.f32.mrf.mxu0 }
  0xaa   :  { %v146_v23 = vadd.f32 %v242_v22, %v145_v21 }
  0xac   :  { %v160_v27 = vadd.f32 %v159_v20, %v146_v23 }
  0xb1   :  { %v147_v24 = vpop.f32.mrf.mxu0 }
  0xb2   :  { %v148_v25 = vadd.f32 %v242_v22, %v147_v24 }
  0xb4   :  { %v162_v28 = vadd.f32 %v161_v26, %v148_v25 }
  0xb6   :  { %v232_v29 = vpack.c.bf16 %v162_v28, %v160_v27 }
  0xb8   :  { %233 = vst [vmem:[#allocation7] sm:$0xff] %v232_v29  }
  0xb9   :  { %180 = dma.vmem_to_hbm [thread:$0]  %s173_s27, 128, %s175_s30, [#allocation4], %s325_s24, %s325_s24, %s326_s25  }
  0xba   :  { %319 = dma.done.wait [#allocation4], 128  }
  0xbb   :  { %320 = vsyncadd [#allocation4], 4294967168 }
  0xbc   :  { %185 = vsyncpa [#allocation3], 1 }
  0xbd   :  { %186 = vsyncpa [#allocation6], 1 }
  0xbe   :  { %187 = vsyncpa [#allocation4], 1 }

</bundles_post_ra>
